<compile_context>
chip_gen: v7x
topology: tpu7x:2x2x1
jax: 0.10.0
libtpu: 0.0.40
codegen_flags: <defaults>
</compile_context>

<pallas_src>
import math
import functools

import jax
import jax.numpy as jnp
from jax.experimental import pallas as pl
from jax.experimental.pallas import tpu as pltpu

LANE = 128      # lane width of a vreg (last-dim granularity)
SUBLANE = 8     # sublane count of a vreg (second-to-last-dim granularity)


def _cdiv(a, b):
    return -(-a // b)


def _round_up(n, m):
    return _cdiv(n, m) * m


# ----------------------------------------------------------------------------
# Kernel
# ----------------------------------------------------------------------------
def policy_kernel(x_ref, w1_ref, b1_ref, w2_ref, b2_ref, w3_ref, b3_ref, o_ref):
    tb = x_ref.shape[0]
    in_dim = x_ref.shape[1]          # tiny (e.g. 4), static at trace time
    h1_p = w1_ref.shape[1]

    x = x_ref[...]

    # ---- Layer 1 on the VPU -------------------------------------------------
    # Rank-1-update sum over the (tiny) contracting dim: avoids both padding x
    # to 128 lanes in HBM and a degenerate K=4 MXU pass.  f32 accumulation.
    h = jnp.broadcast_to(b1_ref[...], (tb, h1_p)).astype(jnp.float32)
    for k in range(in_dim):          # static unroll (in_dim ~ 4)
        h = h + (x[:, k:k + 1].astype(jnp.float32) *
                 w1_ref[k:k + 1, :].astype(jnp.float32))
    h = jnp.maximum(h, 0.0)

    # ---- Layers 2 & 3 on the MXU (f32 accumulation, f32 biases) -------------
    # Weights are already stored in the compute dtype (f32 or bf16) by the
    # wrapper, so the only in-kernel cast is the (necessary) activation cast.
    h = jnp.dot(h.astype(w2_ref.dtype), w2_ref[...],
                preferred_element_type=jnp.float32) + b2_ref[...]
    h = jnp.maximum(h, 0.0)

    out = jnp.dot(h.astype(w3_ref.dtype), w3_ref[...],
                  preferred_element_type=jnp.float32) + b3_ref[...]
    o_ref[...] = out.astype(o_ref.dtype)


# ----------------------------------------------------------------------------
# Parameter prep (run ONCE, not per forward call)
# ----------------------------------------------------------------------------
def prepare_policy_params(w1, b1, w2, b2, w3, b3, *, compute_dtype=jnp.float32):
    """Zero-pad feature dims to 128 lanes and cast the MXU weights once.

    Weights stored (in_features, out_features); biases any shape broadcastable
    to (1, out_features).  Padded columns are zero, so padded hidden units are
    exactly 0 after ReLU and padded logits are exactly 0.
    Layer-1 weights stay f32 (used on the VPU); biases stay f32.
    """
    in_dim, h1 = w1.shape
    h2 = w2.shape[1]
    n_actions = w3.shape[1]
    h1_p, h2_p, out_p = (_round_up(d, LANE) for d in (h1, h2, n_actions))

    w1_p = jnp.zeros((in_dim, h1_p), jnp.float32).at[:, :h1].set(
        w1.astype(jnp.float32))
    b1_p = jnp.zeros((1, h1_p), jnp.float32).at[:, :h1].set(
        b1.reshape(1, -1).astype(jnp.float32))
    w2_p = jnp.zeros((h1_p, h2_p), compute_dtype).at[:h1, :h2].set(
        w2.astype(compute_dtype))
    b2_p = jnp.zeros((1, h2_p), jnp.float32).at[:, :h2].set(
        b2.reshape(1, -1).astype(jnp.float32))
    w3_p = jnp.zeros((h2_p, out_p), compute_dtype).at[:h2, :n_actions].set(
        w3.astype(compute_dtype))
    b3_p = jnp.zeros((1, out_p), jnp.float32).at[:, :n_actions].set(
        b3.reshape(1, -1).astype(jnp.float32))

    return dict(w1=w1_p, b1=b1_p, w2=w2_p, b2=b2_p, w3=w3_p, b3=b3_p)


# ----------------------------------------------------------------------------
# Forward
# ----------------------------------------------------------------------------
def _batch_tiling(batch, block_batch, *, min_split_rows=64):
    """Balanced batch tiles; >=2 tiles for mid/large batches (v7x dual-TC)."""
    num_tiles = _cdiv(batch, block_batch)
    if num_tiles < 2 and batch >= min_split_rows:
        num_tiles = 2
    tb = _round_up(_cdiv(batch, num_tiles), SUBLANE)
    grid = _cdiv(batch, tb)
    b_pad = grid * tb
    return tb, grid, b_pad


def policy_forward(x, params, *, n_actions, block_batch=1024,
                   out_dtype=jnp.float32):
    """Policy MLP forward.  x: (batch, in_dim) f32; returns (batch, n_actions)."""
    batch, in_dim = x.shape
    w1, b1 = params["w1"], params["b1"]
    w2, b2 = params["w2"], params["b2"]
    w3, b3 = params["w3"], params["b3"]
    out_p = w3.shape[1]

    tb, grid, b_pad = _batch_tiling(batch, block_batch)

    # Only per-call padding: the batch tail (tiny with balanced tiles).
    x_in = x
    if b_pad != batch:
        x_in = jnp.zeros((b_pad, in_dim), x.dtype).at[:batch].set(x)

    # Weights/biases: constant block index -> stay VMEM-resident across grid.
    resident = lambda shape: pl.BlockSpec(shape, lambda i: (0, 0))

    out_padded = pl.pallas_call(
        policy_kernel,
        out_shape=jax.ShapeDtypeStruct((b_pad, out_p), out_dtype),
        grid=(grid,),
        in_specs=[
            # x streamed unpadded: last dim = full array extent (legal block).
            pl.BlockSpec((tb, in_dim), lambda i: (i, 0)),
            resident(w1.shape), resident(b1.shape),
            resident(w2.shape), resident(b2.shape),
            resident(w3.shape), resident(b3.shape),
        ],
        out_specs=pl.BlockSpec((tb, out_p), lambda i: (i, 0)),
        compiler_params=pltpu.CompilerParams(
            # Independent batch tiles: shard across v7x's two TensorCores;
            # harmless on single-TC v5e/v6e.
            dimension_semantics=("parallel",),
        ),
    )(x_in, w1, b1, w2, b2, w3, b3)

    return out_padded[:batch, :n_actions]


# ----------------------------------------------------------------------------
# Reference / init helpers
# ----------------------------------------------------------------------------
def init_linear(key, fan_in, fan_out):
    # PyTorch nn.Linear default init: U(-1/sqrt(fan_in), 1/sqrt(fan_in)).
    kw, kb = jax.random.split(key)
    bound = 1.0 / math.sqrt(fan_in)
    w = jax.random.uniform(kw, (fan_in, fan_out), jnp.float32, -bound, bound)
    b = jax.random.uniform(kb, (1, fan_out), jnp.float32, -bound, bound)
    return w, b


def reference_forward(x, w1, b1, w2, b2, w3, b3):
    h = jnp.maximum(x @ w1 + b1, 0.0)
    h = jnp.maximum(h @ w2 + b2, 0.0)
    return h @ w3 + b3


if __name__ == "__main__":
    # Shapes consistent with Policy(lr, input_dims=(4,), h1=32, h2=32, n_actions=2)
    batch, in_dim, h1, h2, n_actions = 2, 4, 32, 32, 2

    key = jax.random.PRNGKey(0)
    kx, kxb, k1, k2, k3 = jax.random.split(key, 5)

    x = jax.random.normal(kx, (batch, in_dim), jnp.float32)
    w1, b1 = init_linear(k1, in_dim, h1)
    w2, b2 = init_linear(k2, h1, h2)
    w3, b3 = init_linear(k3, h2, n_actions)

    # Parameters padded/cast exactly once (in training: once per optimizer step),
    # not on every forward call.
    params_f32 = prepare_policy_params(w1, b1, w2, b2, w3, b3)
    fwd = jax.jit(functools.partial(policy_forward, n_actions=n_actions))

    # Tiny online-RL style batch (single grid step).
    out = jax.block_until_ready(fwd(x, params_f32))
    ref = reference_forward(x, w1, b1, w2, b2, w3, b3)
    assert out.shape == (batch, n_actions)
    assert jnp.allclose(out, ref, atol=2e-5, rtol=2e-5)

    # Rollout-sized batch: balanced tiles (300 -> 2 x 152 rows, 4 padded rows),
    # grid of 2 so a v7x megacore splits the work.
    xb = jax.random.normal(kxb, (300, in_dim), jnp.float32)
    out_b = jax.block_until_ready(fwd(xb, params_f32))
    ref_b = reference_forward(xb, w1, b1, w2, b2, w3, b3)
    assert out_b.shape == (300, n_actions)
    assert jnp.allclose(out_b, ref_b, atol=2e-5, rtol=2e-5)

    # bf16 MXU fast path (v6e/v7x): weights cast once in the wrapper, f32
    # accumulation / biases in-kernel; compared loosely against the f32 reference.
    params_bf16 = prepare_policy_params(w1, b1, w2, b2, w3, b3,
                                        compute_dtype=jnp.bfloat16)
    out_bf = jax.block_until_ready(fwd(xb, params_bf16))
    assert out_bf.shape == (300, n_actions)
    assert jnp.allclose(out_bf.astype(jnp.float32), ref_b, atol=5e-2, rtol=5e-2)

    print("KERNEL_OK")
</pallas_src>

<mosaic_0001>
module attributes {stable_mosaic.version = 11 : i64} {
  func.func @policy_kernel(%arg0: i32, %arg1: memref<8x4xf32, #tpu.memory_space<vmem>>, %arg2: memref<4x128xf32, #tpu.memory_space<vmem>>, %arg3: memref<1x128xf32, #tpu.memory_space<vmem>>, %arg4: memref<128x128xf32, #tpu.memory_space<vmem>>, %arg5: memref<1x128xf32, #tpu.memory_space<vmem>>, %arg6: memref<128x128xf32, #tpu.memory_space<vmem>>, %arg7: memref<1x128xf32, #tpu.memory_space<vmem>>, %arg8: memref<8x128xf32, #tpu.memory_space<vmem>>) attributes {dimension_semantics = [#tpu.dimension_semantics<parallel>], iteration_bounds = array<i64: 1>, scalar_prefetch = 0 : i64, scratch_operands = 0 : i64, tpu.core_type = #tpu.core_type<tc>, window_params = [{transform_indices = @transform_0, window_bounds = array<i64: 8, 4>}, {pipeline_mode = #tpu.pipeline_mode<synchronous>, transform_indices = @transform_1, window_bounds = array<i64: 4, 128>}, {pipeline_mode = #tpu.pipeline_mode<synchronous>, transform_indices = @transform_2, window_bounds = array<i64: 1, 128>}, {pipeline_mode = #tpu.pipeline_mode<synchronous>, transform_indices = @transform_3, window_bounds = array<i64: 128, 128>}, {pipeline_mode = #tpu.pipeline_mode<synchronous>, transform_indices = @transform_4, window_bounds = array<i64: 1, 128>}, {pipeline_mode = #tpu.pipeline_mode<synchronous>, transform_indices = @transform_5, window_bounds = array<i64: 128, 128>}, {pipeline_mode = #tpu.pipeline_mode<synchronous>, transform_indices = @transform_6, window_bounds = array<i64: 1, 128>}, {transform_indices = @transform_7, window_bounds = array<i64: 8, 128>}]} {
    %c0 = arith.constant 0 : index
    %c0_0 = arith.constant 0 : index
    %0 = vector.load %arg1[%c0, %c0_0] : memref<8x4xf32, #tpu.memory_space<vmem>>, vector<8x4xf32>
    %c0_1 = arith.constant 0 : index
    %c0_2 = arith.constant 0 : index
    %1 = vector.load %arg3[%c0_1, %c0_2] : memref<1x128xf32, #tpu.memory_space<vmem>>, vector<1x128xf32>
    %2 = vector.shape_cast %1 : vector<1x128xf32> to vector<1x128xf32>
    %3 = vector.broadcast %2 : vector<1x128xf32> to vector<8x128xf32>
    %4 = vector.extract_strided_slice %0 {offsets = [0, 0], sizes = [8, 1], strides = [1, 1]} : vector<8x4xf32> to vector<8x1xf32>
    %c0_3 = arith.constant 0 : index
    %c0_4 = arith.constant 0 : index
    %5 = vector.load %arg2[%c0_3, %c0_4] : memref<4x128xf32, #tpu.memory_space<vmem>>, vector<1x128xf32>
    %6 = vector.broadcast %4 : vector<8x1xf32> to vector<8x128xf32>
    %7 = vector.broadcast %5 : vector<1x128xf32> to vector<8x128xf32>
    %8 = arith.mulf %6, %7 : vector<8x128xf32>
    %9 = arith.addf %3, %8 : vector<8x128xf32>
    %10 = vector.extract_strided_slice %0 {offsets = [0, 1], sizes = [8, 1], strides = [1, 1]} : vector<8x4xf32> to vector<8x1xf32>
    %c1 = arith.constant 1 : index
    %c0_5 = arith.constant 0 : index
    %11 = vector.load %arg2[%c1, %c0_5] : memref<4x128xf32, #tpu.memory_space<vmem>>, vector<1x128xf32>
    %12 = vector.broadcast %10 : vector<8x1xf32> to vector<8x128xf32>
    %13 = vector.broadcast %11 : vector<1x128xf32> to vector<8x128xf32>
    %14 = arith.mulf %12, %13 : vector<8x128xf32>
    %15 = arith.addf %9, %14 : vector<8x128xf32>
    %16 = vector.extract_strided_slice %0 {offsets = [0, 2], sizes = [8, 1], strides = [1, 1]} : vector<8x4xf32> to vector<8x1xf32>
    %c2 = arith.constant 2 : index
    %c0_6 = arith.constant 0 : index
    %17 = vector.load %arg2[%c2, %c0_6] : memref<4x128xf32, #tpu.memory_space<vmem>>, vector<1x128xf32>
    %18 = vector.broadcast %16 : vector<8x1xf32> to vector<8x128xf32>
    %19 = vector.broadcast %17 : vector<1x128xf32> to vector<8x128xf32>
    %20 = arith.mulf %18, %19 : vector<8x128xf32>
    %21 = arith.addf %15, %20 : vector<8x128xf32>
    %22 = vector.extract_strided_slice %0 {offsets = [0, 3], sizes = [8, 1], strides = [1, 1]} : vector<8x4xf32> to vector<8x1xf32>
    %c3 = arith.constant 3 : index
    %c0_7 = arith.constant 0 : index
    %23 = vector.load %arg2[%c3, %c0_7] : memref<4x128xf32, #tpu.memory_space<vmem>>, vector<1x128xf32>
    %24 = vector.broadcast %22 : vector<8x1xf32> to vector<8x128xf32>
    %25 = vector.broadcast %23 : vector<1x128xf32> to vector<8x128xf32>
    %26 = arith.mulf %24, %25 : vector<8x128xf32>
    %27 = arith.addf %21, %26 : vector<8x128xf32>
    %cst = arith.constant 0.000000e+00 : f32
    %28 = vector.broadcast %cst : f32 to vector<8x128xf32>
    %29 = arith.maximumf %27, %28 : vector<8x128xf32>
    %c0_8 = arith.constant 0 : index
    %c0_9 = arith.constant 0 : index
    %30 = vector.load %arg4[%c0_8, %c0_9] : memref<128x128xf32, #tpu.memory_space<vmem>>, vector<128x128xf32>
    %cst_10 = arith.constant dense<0.000000e+00> : vector<8x128xf32>
    %31 = tpu.matmul %29, %30, %cst_10 {dimension_numbers = #tpu.dot_dimension_numbers<[1], [0], [0], [1], [0, 0, 1, 1], [], []>} : vector<8x128xf32>, vector<128x128xf32>, vector<8x128xf32> -> vector<8x128xf32>
    %c0_11 = arith.constant 0 : index
    %c0_12 = arith.constant 0 : index
    %32 = vector.load %arg5[%c0_11, %c0_12] : memref<1x128xf32, #tpu.memory_space<vmem>>, vector<1x128xf32>
    %33 = vector.broadcast %32 : vector<1x128xf32> to vector<8x128xf32>
    %34 = arith.addf %31, %33 : vector<8x128xf32>
    %cst_13 = arith.constant 0.000000e+00 : f32
    %35 = vector.broadcast %cst_13 : f32 to vector<8x128xf32>
    %36 = arith.maximumf %34, %35 : vector<8x128xf32>
    %c0_14 = arith.constant 0 : index
    %c0_15 = arith.constant 0 : index
    %37 = vector.load %arg6[%c0_14, %c0_15] : memref<128x128xf32, #tpu.memory_space<vmem>>, vector<128x128xf32>
    %cst_16 = arith.constant dense<0.000000e+00> : vector<8x128xf32>
    %38 = tpu.matmul %36, %37, %cst_16 {dimension_numbers = #tpu.dot_dimension_numbers<[1], [0], [0], [1], [0, 0, 1, 1], [], []>} : vector<8x128xf32>, vector<128x128xf32>, vector<8x128xf32> -> vector<8x128xf32>
    %c0_17 = arith.constant 0 : index
    %c0_18 = arith.constant 0 : index
    %39 = vector.load %arg7[%c0_17, %c0_18] : memref<1x128xf32, #tpu.memory_space<vmem>>, vector<1x128xf32>
    %40 = vector.broadcast %39 : vector<1x128xf32> to vector<8x128xf32>
    %41 = arith.addf %38, %40 : vector<8x128xf32>
    %c0_19 = arith.constant 0 : index
    %c0_20 = arith.constant 0 : index
    %42 = vector.load %arg8[%c0_19, %c0_20] : memref<8x128xf32, #tpu.memory_space<vmem>>, vector<8x128xf32>
    tpu.vector_store %arg8[%c0_19, %c0_20], %41 {strides = array<i32>} : memref<8x128xf32, #tpu.memory_space<vmem>>, vector<8x128xf32>,
    return
  }
  func.func @transform_0(%arg0: i32) -> (i32, i32) {
    %c0_i32 = arith.constant 0 : i32
    %c0_i32_0 = arith.constant 0 : i32
    return %arg0, %c0_i32 : i32, i32
  }
  func.func @transform_1(%arg0: i32) -> (i32, i32) {
    %c0_i32 = arith.constant 0 : i32
    %c0_i32_0 = arith.constant 0 : i32
    %c0_i32_1 = arith.constant 0 : i32
    return %c0_i32, %c0_i32_0 : i32, i32
  }
  func.func @transform_2(%arg0: i32) -> (i32, i32) {
    %c0_i32 = arith.constant 0 : i32
    %c0_i32_0 = arith.constant 0 : i32
    %c0_i32_1 = arith.constant 0 : i32
    return %c0_i32, %c0_i32_0 : i32, i32
  }
  func.func @transform_3(%arg0: i32) -> (i32, i32) {
    %c0_i32 = arith.constant 0 : i32
    %c0_i32_0 = arith.constant 0 : i32
    %c0_i32_1 = arith.constant 0 : i32
    return %c0_i32, %c0_i32_0 : i32, i32
  }
  func.func @transform_4(%arg0: i32) -> (i32, i32) {
    %c0_i32 = arith.constant 0 : i32
    %c0_i32_0 = arith.constant 0 : i32
    %c0_i32_1 = arith.constant 0 : i32
    return %c0_i32, %c0_i32_0 : i32, i32
  }
  func.func @transform_5(%arg0: i32) -> (i32, i32) {
    %c0_i32 = arith.constant 0 : i32
    %c0_i32_0 = arith.constant 0 : i32
    %c0_i32_1 = arith.constant 0 : i32
    return %c0_i32, %c0_i32_0 : i32, i32
  }
  func.func @transform_6(%arg0: i32) -> (i32, i32) {
    %c0_i32 = arith.constant 0 : i32
    %c0_i32_0 = arith.constant 0 : i32
    %c0_i32_1 = arith.constant 0 : i32
    return %c0_i32, %c0_i32_0 : i32, i32
  }
  func.func @transform_7(%arg0: i32) -> (i32, i32) {
    %c0_i32 = arith.constant 0 : i32
    %c0_i32_0 = arith.constant 0 : i32
    return %arg0, %c0_i32 : i32, i32
  }
}

</mosaic_0001>

<bundles_post_ra>
// kernel: policy_forward.1
= control target key start
LH: loop header
LB: loop body
LE: loop exit
PB: predicated region body
PF: predicated region fallthrough
CT: control target
= control target key end

     0   :  { %12 = vsyncpa [#allocation3], 0  ;;  %s643_s0 = inlined_call_operand.vmem [shape: f32[8,4], index: 0, kind: input, shape index: {}]   ;;  %s644_s1 = inlined_call_operand.vmem [shape: f32[4,128], index: 1, kind: input, shape index: {}]   ;;  %s645_s2 = inlined_call_operand.vmem [shape: f32[1,128], index: 2, kind: input, shape index: {}]   ;;  %s646_s3 = inlined_call_operand.hbm [shape: f32[128,128], index: 3, kind: input, shape index: {}]   ;;  %s647_s4 = inlined_call_operand.vmem [shape: f32[1,128], index: 4, kind: input, shape index: {}]   ;;  %s648_s5 = inlined_call_operand.hbm [shape: f32[128,128], index: 5, kind: input, shape index: {}]   ;;  %s649_s6 = inlined_call_operand.vmem [shape: f32[1,128], index: 6, kind: input, shape index: {}]   ;;  %s650_s7 = inlined_call_operand.vmem [shape: f32[8,128], index: 7, kind: output, shape index: {}]  }
   0x1   :  { %13 = vsyncpa [#allocation5], 0  ;;  %s525_s24 = smov [#allocation2]   ;;  %s477_s28 = scalar_lea.hbm %s646_s3, 2048 }
   0x2   :  { %s25_s25 = sshll.u32 %s525_s24, 4  ;;  %p478_p0 = scmp.ne.s32.totalorder %s646_s3, %s477_s28  ;;  %s26_s25 = int_to_ptr.vmem [resolvable:$true] %s25_s25 }
   0x3   :  { %p481_p1 = scmp.lt.u32.totalorder %s477_s28, %s646_s3 }
   0x5   :  { %p483_p2 = pnand %p481_p1, %p478_p0 }
   0x7   :  { %486 = shalt.err (!%p483_p2)
}
   0x8   :  { %s487_s10 = scalar_lea.vmem %s26_s25, 2048  ;;  %p492_p4 = scmp.lt.s32.totalorder %s26_s25, %s26_s25 }
   0x9   :  { %p488_p3 = scmp.ne.s32.totalorder %s26_s25, %s487_s10  ;;  %p493_p5 = scmp.lt.s32.totalorder %s487_s10, %s487_s10 }
   0xb   :  { %p494_p6 = por %p493_p5, %p492_p4 }
   0xd   :  { %p495_p7 = pnand %p494_p6, %p488_p3 }
   0xf   :  { %498 = shalt.err (!%p495_p7)
}
  0x10   :  { %s526_s11 = smov 128   ;;  %s527_s12 = smov 8  }
  0x11   :  { %31 = dma.hbm_to_vmem [thread:$0]  %s646_s3, 2048, %s26_s25, [#allocation3], %s526_s11, %s526_s11, %s527_s12  }
  0x12   :  { %s528_s15 = smov [#allocation4]   ;;  %s499_s19 = scalar_lea.hbm %s648_s5, 2048 }
  0x13   :  { %s39_s16 = sshll.u32 %s528_s15, 4  ;;  %p500_p8 = scmp.ne.s32.totalorder %s648_s5, %s499_s19  ;;  %s40_s16 = int_to_ptr.vmem [resolvable:$true] %s39_s16 }
  0x14   :  { %p503_p9 = scmp.lt.u32.totalorder %s499_s19, %s648_s5 }
  0x16   :  { %p505_p10 = pnand %p503_p9, %p500_p8 }
  0x18   :  { %508 = shalt.err (!%p505_p10)
}
  0x19   :  { %s509_s24 = scalar_lea.vmem %s40_s16, 2048  ;;  %p514_p12 = scmp.lt.s32.totalorder %s40_s16, %s40_s16 }
  0x1a   :  { %p510_p11 = scmp.ne.s32.totalorder %s40_s16, %s509_s24  ;;  %p515_p13 = scmp.lt.s32.totalorder %s509_s24, %s509_s24 }
  0x1c   :  { %p516_p0 = por %p515_p13, %p514_p12 }
  0x1e   :  { %p517_p1 = pnand %p516_p0, %p510_p11 }
  0x20   :  { %520 = shalt.err (!%p517_p1)
}
  0x21   :  { %45 = dma.hbm_to_vmem [thread:$0]  %s648_s5, 2048, %s40_s16, [#allocation5], %s526_s11, %s526_s11, %s527_s12  }
  0x22   :  { %521 = dma.done.wait [#allocation3], 2048  }
  0x23   :  { %522 = vsyncadd [#allocation3], 4294965248 }
  0x24   :  { %523 = dma.done.wait [#allocation5], 2048  }
  0x25   :  { %524 = vsyncadd [#allocation5], 4294965248  ;;  %v529_v0 = vmov 0   ;;  %v530_v1 = vmov 2   ;;  %v531_v2 = vmov 0.0|0.0   ;;  %v54_v3 = vld [vmem:[%s643_s0] sm:$0xff] }
  0x26   :  { %472 = vset.pattern.permute.xlu0 %v529_v0  ;;  %474 = vset.pattern.permute.xlu1 %v530_v1  ;;  %v108_v4 = vld [vmem:[#allocation2] sm:$0xff]  ;;  %v109_v5 = vld [vmem:[#allocation2 + $0x8] sm:$0xff]  ;;  %v110_v7 = vld [vmem:[#allocation2 + $0x10] sm:$0xff]  ;;  %v532_v12 = vmov 1   ;;  %v533_v13 = vmov 3   ;;  %vm534_vm0 = vmmov 0  }
  0x27   :  { %413 = vmatprep.subr.bf16.mxu0 %v531_v2  ;;  %437 = vmatprep.subr.bf16.mxu1 %v531_v2  ;;  %v414_v6 = vpack.c.bf16 %v109_v5, %v108_v4  ;;  %v111_v8 = vld [vmem:[#allocation2 + $0x18] sm:$0xff]  ;;  %v112_v10 = vld [vmem:[#allocation2 + $0x20] sm:$0xff]  ;;  %v113_v11 = vld [vmem:[#allocation2 + $0x28] sm:$0xff]  ;;  %v535_v23 = vmov 0.0  }
  0x28   :  { %65 = vperm.xlu0 %472, %v54_v3   ;;  %87 = vperm.xlu1 %474, %v54_v3   ;;  %v417_v9 = vpack.c.bf16 %v111_v8, %v110_v7  ;;  %v420_v14 = vpack.c.bf16 %v113_v11, %v112_v10  ;;  %v114_v15 = vld [vmem:[#allocation2 + $0x30] sm:$0xff]  ;;  %v115_v16 = vld [vmem:[#allocation2 + $0x38] sm:$0xff]  ;;  %v116_v18 = vld [vmem:[#allocation2 + $0x40] sm:$0xff] }
  0x29   :  { %415 = vmatpush3.bf16.msra.mxu0 %v414_v6  ;;  %v423_v17 = vpack.c.bf16 %v115_v16, %v114_v15  ;;  %v117_v19 = vld [vmem:[#allocation2 + $0x48] sm:$0xff]  ;;  %v118_v21 = vld [vmem:[#allocation2 + $0x50] sm:$0xff]  ;;  %v119_v22 = vld [vmem:[#allocation2 + $0x58] sm:$0xff]  ;;  %375 = vmatprep.mubr.msk.f32.mxu0 %vm534_vm0, %v535_v23 }
  0x2a   :  { %416 = vmatprep.subr.bf16.mxu0 %v531_v2  ;;  %v426_v20 = vpack.c.bf16 %v117_v19, %v116_v18  ;;  %v202_v24 = vld [vmem:[#allocation4] sm:$0xff]  ;;  %v203_v25 = vld [vmem:[#allocation4 + $0x8] sm:$0xff]  ;;  %v204_v26 = vld [vmem:[#allocation4 + $0x10] sm:$0xff]  ;;  %410 = vmatprep.mubr.msk.f32.mxu1 %vm534_vm0, %v535_v23  ;;  %v429_v29 = vpack.c.bf16 %v119_v22, %v118_v21 }
  0x2b   :  { %v438_v27 = vpack.c.bf16 %v203_v25, %v202_v24  ;;  %v205_v28 = vld [vmem:[#allocation4 + $0x18] sm:$0xff]  ;;  %v120_v30 = vld [vmem:[#allocation2 + $0x60] sm:$0xff]  ;;  %v121_v32 = vld [vmem:[#allocation2 + $0x68] sm:$0xff] }
  0x2c   :  { %473 = vset.pattern.permute.xlu0 %v532_v12  ;;  %475 = vset.pattern.permute.xlu1 %v533_v13  ;;  %v441_v31 = vpack.c.bf16 %v205_v28, %v204_v26  ;;  %v206_v33 = vld [vmem:[#allocation4 + $0x20] sm:$0xff]  ;;  %v207_v34 = vld [vmem:[#allocation4 + $0x28] sm:$0xff]  ;;  %v432_v35 = vpack.c.bf16 %v121_v32, %v120_v30  ;;  %v122_v36 = vld [vmem:[#allocation2 + $0x70] sm:$0xff] }
  0x2d   :  { %76 = vperm.xlu0 %473, %v54_v3   ;;  %98 = vperm.xlu1 %475, %v54_v3   ;;  %v444_v37 = vpack.c.bf16 %v207_v34, %v206_v33  ;;  %v123_v38 = vld [vmem:[#allocation2 + $0x78] sm:$0xff]  ;;  %v208_v39 = vld [vmem:[#allocation4 + $0x30] sm:$0xff]  ;;  %v210_v43 = vld [vmem:[#allocation4 + $0x40] sm:$0xff] }
  0x2e   :  { %418 = vmatpush3.bf16.msra.mxu0 %v417_v9  ;;  %439 = vmatpush3.bf16.msra.mxu1 %v438_v27  ;;  %v209_v40 = vld [vmem:[#allocation4 + $0x38] sm:$0xff]  ;;  %v435_v41 = vpack.c.bf16 %v123_v38, %v122_v36  ;;  %v211_v44 = vld [vmem:[#allocation4 + $0x48] sm:$0xff]  ;;  %v212_v46 = vld [vmem:[#allocation4 + $0x50] sm:$0xff] }
  0x2f   :  { %419 = vmatprep.subr.bf16.mxu0 %v531_v2  ;;  %440 = vmatprep.subr.bf16.mxu1 %v531_v2  ;;  %v447_v42 = vpack.c.bf16 %v209_v40, %v208_v39  ;;  %v450_v45 = vpack.c.bf16 %v211_v44, %v210_v43  ;;  %v213_v47 = vld [vmem:[#allocation4 + $0x58] sm:$0xff]  ;;  %v214_v49 = vld [vmem:[#allocation4 + $0x60] sm:$0xff]  ;;  %v215_v50 = vld [vmem:[#allocation4 + $0x68] sm:$0xff] }
  0x30   :  { %v453_v48 = vpack.c.bf16 %v213_v47, %v212_v46  ;;  %v456_v51 = vpack.c.bf16 %v215_v50, %v214_v49  ;;  %v303_v52 = vld [vmem:[%s644_s1] ss:$0 sm:$0xff]  ;;  %v304_v57 = vld [vmem:[%s644_s1 + $0x1] ss:$0 sm:$0xff]  ;;  %v305_v58 = vld [vmem:[%s644_s1 + $0x2] ss:$0 sm:$0xff] }
  0x31   :  { %476 = vset.pattern.permute.xlu0 %v533_v13  ;;  %v302_v56 = vld [vmem:[%s645_s2] ss:$0 sm:$0xff]  ;;  %v306_v60 = vld [vmem:[%s644_s1 + $0x3] ss:$0 sm:$0xff]  ;;  %v216_v6 = vld [vmem:[#allocation4 + $0x70] sm:$0xff] }
  0x32   :  { %421 = vmatpush3.bf16.msra.mxu0 %v420_v14  ;;  %442 = vmatpush3.bf16.msra.mxu1 %v441_v31  ;;  %v217_v7 = vld [vmem:[#allocation4 + $0x78] sm:$0xff]  ;;  %v307_v9 = vld [vmem:[%s647_s4] ss:$0 sm:$0xff] }
  0x33   :  { %422 = vmatprep.subr.bf16.mxu0 %v531_v2  ;;  %443 = vmatprep.subr.bf16.mxu1 %v531_v2  ;;  %v459_v8 = vpack.c.bf16 %v217_v7, %v216_v6  ;;  %v308_v14 = vld [vmem:[%s649_s6] ss:$0 sm:$0xff] }
  0x36   :  { %424 = vmatpush3.bf16.msra.mxu0 %v423_v17  ;;  %445 = vmatpush3.bf16.msra.mxu1 %v444_v37 }
  0x37   :  { %425 = vmatprep.subr.bf16.mxu0 %v531_v2  ;;  %446 = vmatprep.subr.bf16.mxu1 %v531_v2 }
  0x3a   :  { %427 = vmatpush3.bf16.msra.mxu0 %v426_v20  ;;  %448 = vmatpush3.bf16.msra.mxu1 %v447_v42 }
  0x3b   :  { %428 = vmatprep.subr.bf16.mxu0 %v531_v2  ;;  %449 = vmatprep.subr.bf16.mxu1 %v531_v2 }
  0x3e   :  { %430 = vmatpush3.bf16.msra.mxu0 %v429_v29  ;;  %451 = vmatpush3.bf16.msra.mxu1 %v450_v45 }
  0x3f   :  { %431 = vmatprep.subr.bf16.mxu0 %v531_v2  ;;  %452 = vmatprep.subr.bf16.mxu1 %v531_v2 }
  0x42   :  { %433 = vmatpush3.bf16.msra.mxu0 %v432_v35  ;;  %454 = vmatpush3.bf16.msra.mxu1 %v453_v48 }
  0x43   :  { %434 = vmatprep.subr.bf16.mxu0 %v531_v2  ;;  %455 = vmatprep.subr.bf16.mxu1 %v531_v2 }
  0x46   :  { %436 = vmatpush3.bf16.msra.mxu0 %v435_v41  ;;  %457 = vmatpush3.bf16.msra.mxu1 %v456_v51 }
  0x47   :  { %458 = vmatprep.subr.bf16.mxu1 %v531_v2 }
  0x4a   :  { %460 = vmatpush3.bf16.msra.mxu1 %v459_v8 }
  0xa7   :  { %v66_v53 = vpop.permute.xlu0 %65  ;;  %v88_v54 = vpop.permute.xlu1 %87 }
  0xa8   :  { %v72_v55 = vmul.f32 %v303_v52, %v66_v53  ;;  %v94_v0 = vmul.f32 %v305_v58, %v88_v54 }
  0xaa   :  { %v73_v62 = vadd.f32 %v302_v56, %v72_v55 }
  0xac   :  { %v77_v59 = vpop.permute.xlu0 %76  ;;  %v99_v61 = vpop.permute.xlu1 %98 }
  0xad   :  { %v83_v63 = vmul.f32 %v304_v57, %v77_v59  ;;  %v105_v2 = vmul.f32 %v306_v60, %v99_v61 }
  0xaf   :  { %v84_v1 = vadd.f32 %v83_v63, %v73_v62 }
  0xb1   :  { %v95_v3 = vadd.f32 %v94_v0, %v84_v1 }
  0xb3   :  { %v106_v4 = vadd.f32 %v105_v2, %v95_v3 }
  0xb5   :  { %v107_v5 = vmax.f32 %v106_v4, 0.0 }
  0xb7   :  { %376 = vmatmul.mubr.f32.vlgmr.msra.gmra.mrb[0].mxu0 %v107_v5 }
 0x18a   :  { %v197_v10 = vpop.f32.mrb[0].mxu0 }
 0x18b   :  { %v198_v11 = vadd.f32 %v307_v9, %v197_v10  ;;  %v377_v12 = vpop.f32.mrb[1].mxu0 }
 0x18d   :  { %v201_v13 = vmax.f32 %v198_v11, 0.0 }
 0x18f   :  { %411 = vmatmul.mubr.f32.vlgmr.msra.gmra.mrb[0].mxu1 %v201_v13 }
 0x262   :  { %v291_v15 = vpop.f32.mrb[0].mxu1 }
 0x263   :  { %v292_v16 = vadd.f32 %v308_v14, %v291_v15  ;;  %v412_v17 = vpop.f32.mrb[1].mxu1 }
 0x265   :  { %295 = vst [vmem:[%s650_s7] sm:$0xff] %v292_v16 }
 0x266   :  { %300 = vsyncpa [#allocation3], 1 }
 0x267   :  { %301 = vsyncpa [#allocation5], 1 }

</bundles_post_ra>
